<compile_context>
chip_gen: v7x
topology: tpu7x:2x2x1
jax: 0.10.0
libtpu: 0.0.40
codegen_flags: <defaults>
</compile_context>

<pallas_src>
import functools
import math

import jax
import jax.numpy as jnp
from jax.experimental import pallas as pl
from jax.experimental.pallas import tpu as pltpu


# ----------------------------------------------------------------------------
# Kernel 1: wrapped module forward  (Linear: y = x @ W + b) with K-reduction
# ----------------------------------------------------------------------------
def _linear_kernel(x_ref, w_ref, b_ref, o_ref, acc_ref):
    k = pl.program_id(2)

    @pl.when(k == 0)
    def _():
        # Initialize the accumulator with the broadcast bias (saves the zero-fill
        # and the epilogue add).
        acc_ref[...] = jnp.broadcast_to(
            b_ref[...].astype(jnp.float32), acc_ref.shape
        )

    acc_ref[...] += jnp.dot(
        x_ref[...], w_ref[...], preferred_element_type=jnp.float32
    )

    @pl.when(k == pl.num_programs(2) - 1)
    def _():
        o_ref[...] = acc_ref[...].astype(o_ref.dtype)


def _round_up(x, m):
    return -(-x // m) * m


def _tile_dim(dim, tile):
    """Return (effective_tile, padded_dim).

    Small dims use a single full-extent block; large non-divisible dims are
    padded up to a multiple of the tile (no silent full-dim fallback).
    """
    if dim <= tile:
        return dim, dim
    if dim % tile == 0:
        return tile, dim
    return tile, _round_up(dim, tile)


def linear_forward(x, w, b, *, tm=256, tn=512, tk=512, compute_dtype=None):
    """x: (B, D_in), w: (D_in, D_out), b: (1, D_out) -> (B, D_out).

    compute_dtype=jnp.bfloat16 feeds bf16 operands to the MXU (f32 accumulation);
    leave None to match the wrapped module's f32 numerics exactly.
    """
    B, D_in = x.shape
    D_in2, D_out = w.shape
    assert D_in == D_in2 and b.shape == (1, D_out)
    out_dtype = x.dtype

    if compute_dtype is not None:
        x = x.astype(compute_dtype)
        w = w.astype(compute_dtype)

    tm_e, Bp = _tile_dim(B, tm)
    tn_e, Np = _tile_dim(D_out, tn)
    tk_e, Kp = _tile_dim(D_in, tk)

    if (Bp, Kp) != (B, D_in):
        x = jnp.pad(x, ((0, Bp - B), (0, Kp - D_in)))
    if (Kp, Np) != (D_in, D_out):
        w = jnp.pad(w, ((0, Kp - D_in), (0, Np - D_out)))
    if Np != D_out:
        b = jnp.pad(b, ((0, 0), (0, Np - D_out)))

    out = pl.pallas_call(
        _linear_kernel,
        out_shape=jax.ShapeDtypeStruct((Bp, Np), out_dtype),
        grid_spec=pltpu.PrefetchScalarGridSpec(
            num_scalar_prefetch=0,
            grid=(Bp // tm_e, Np // tn_e, Kp // tk_e),
            in_specs=[
                pl.BlockSpec((tm_e, tk_e), lambda i, j, k: (i, k)),
                pl.BlockSpec((tk_e, tn_e), lambda i, j, k: (k, j)),
                pl.BlockSpec((1, tn_e), lambda i, j, k: (0, j)),
            ],
            out_specs=pl.BlockSpec((tm_e, tn_e), lambda i, j, k: (i, j)),
            scratch_shapes=[pltpu.VMEM((tm_e, tn_e), jnp.float32)],
        ),
        compiler_params=pltpu.CompilerParams(
            dimension_semantics=("parallel", "parallel", "arbitrary")
        ),
    )(x, w, b)

    if (Bp, Np) != (B, D_out):
        out = out[:B, :D_out]
    return out


# ----------------------------------------------------------------------------
# Kernel 2: SWA parameter averaging (memory-bound elementwise stream, per leaf)
#   out = p_model                                   if n_averaged == 0
#   out = p_swa + (p_model - p_swa) / (n_avg + 1)   otherwise
# ----------------------------------------------------------------------------
_SUBLANES = 8
_TARGET_BLOCK_BYTES = 2 * 1024 * 1024   # ~2 MiB/operand; 3 ops x 2 bufs ~= 12 MiB
_SWA_VMEM_LIMIT = 32 * 1024 * 1024      # explicit so v5e's 16 MiB default is no cliff


def _swa_update_kernel(n_ref, p_swa_ref, p_model_ref, o_ref):
    n = n_ref[0]  # int32 scalar from SMEM (scalar prefetch)

    @pl.when(n == 0)
    def _():
        o_ref[...] = p_model_ref[...].astype(o_ref.dtype)

    @pl.when(n != 0)
    def _():
        inv = 1.0 / (n.astype(jnp.float32) + 1.0)
        p_swa = p_swa_ref[...].astype(jnp.float32)
        p_model = p_model_ref[...].astype(jnp.float32)
        o_ref[...] = (p_swa + (p_model - p_swa) * inv).astype(o_ref.dtype)


def _as_2d(x):
    """Cheap (contiguous) 2-D view of a leaf for the elementwise SWA kernel."""
    if x.ndim == 0:
        return x.reshape(1, 1)
    if x.ndim == 1:
        return x.reshape(1, x.shape[0])
    if x.ndim == 2:
        return x
    return x.reshape(-1, x.shape[-1])


def _pick_block_rows(R, C, itemsize):
    """Largest row-tile that (a) divides R, (b) is a multiple of 8, (c) stays
    within the per-operand byte budget, and (d) leaves >= 2 grid steps when the
    leaf is big enough (so both v7x TensorCores get work)."""
    cap = max(_SUBLANES, _TARGET_BLOCK_BYTES // max(1, C * itemsize))
    if R >= 2 * _SUBLANES:
        cap = min(cap, R // 2)
    cap = min(cap, R, 32768)
    best = None
    r = _SUBLANES
    while r <= cap:
        if R % r == 0:
            best = r
        r += _SUBLANES
    # Fallback: single full-extent block (always legal; only perf-suboptimal).
    return best if best is not None else R


def _swa_leaf_update(n_dev, p_swa2d, p_model2d):
    """In-place SWA update of one 2-D leaf view (p_swa aliased to the output)."""
    R, C = p_swa2d.shape
    br = _pick_block_rows(R, C, jnp.dtype(p_swa2d.dtype).itemsize)
    return pl.pallas_call(
        _swa_update_kernel,
        out_shape=jax.ShapeDtypeStruct((R, C), p_swa2d.dtype),
        grid_spec=pltpu.PrefetchScalarGridSpec(
            num_scalar_prefetch=1,
            grid=(R // br,),
            in_specs=[
                pl.BlockSpec((br, C), lambda i, n: (i, 0)),
                pl.BlockSpec((br, C), lambda i, n: (i, 0)),
            ],
            out_specs=pl.BlockSpec((br, C), lambda i, n: (i, 0)),
        ),
        compiler_params=pltpu.CompilerParams(
            dimension_semantics=("parallel",),
            vmem_limit_bytes=_SWA_VMEM_LIMIT,
        ),
        # Positional arg 0 is the scalar-prefetch counter; arg 1 (p_swa) aliases
        # output 0 -> true in-place HBM update. Do not reorder the operands.
        input_output_aliases={1: 0},
    )(n_dev, p_swa2d, p_model2d)


# ----------------------------------------------------------------------------
# AveragedModel equivalent
# ----------------------------------------------------------------------------
class AveragedModelPallas:
    """SWA-averaged copy of a small linear model; forward + update in Pallas."""

    def __init__(self, model_params):
        leaves, treedef = jax.tree_util.tree_flatten(model_params)
        self._treedef = treedef
        self._shapes = [l.shape for l in leaves]
        self._dtypes = [jnp.asarray(l).dtype for l in leaves]

        # SWA parameters live per leaf, in the leaf's natural shape/dtype.
        # (True copies, so donating them later never invalidates the caller's arrays.)
        self._swa_leaves = [jnp.array(l, copy=True) for l in leaves]

        self.n_averaged = 0                               # python mirror (API compat)
        self._n_dev = jnp.zeros((1,), dtype=jnp.int32)    # device-resident counter

        shapes = self._shapes

        # One fused, jitted update: per-leaf Pallas SWA kernels, SWA leaves donated
        # so the updates happen in place; no flatten/pad/unflatten passes.
        @functools.partial(jax.jit, donate_argnums=(1,))
        def _update(n_dev, swa_leaves, model_leaves):
            new_leaves = []
            for p_swa, p_model, shp in zip(swa_leaves, model_leaves, shapes):
                p_model = p_model.astype(p_swa.dtype)
                out2 = _swa_leaf_update(n_dev, _as_2d(p_swa), _as_2d(p_model))
                new_leaves.append(out2.reshape(shp))
            return new_leaves, n_dev + 1

        self._update = _update

    # -- structured (per-leaf) view: zero-cost, no data movement ---------------
    @property
    def params(self):
        return jax.tree_util.tree_unflatten(self._treedef, self._swa_leaves)

    # -- forward: delegates to the wrapped module (Pallas matmul) --------------
    def forward(self, x):
        p = self.params
        return linear_forward(x, p["w"], p["b"])

    __call__ = forward

    # -- SWA running-average update ---------------------------------------------
    def update_parameters(self, model_params):
        # TODO(synk): custom avg_fn callables / use_buffers=True are not
        # supported; only the default equally-weighted SWA average is kernelized.
        model_leaves = jax.tree_util.tree_leaves(model_params)
        self._swa_leaves, self._n_dev = self._update(
            self._n_dev, self._swa_leaves, model_leaves
        )
        self.n_averaged += 1


# ----------------------------------------------------------------------------
# Demo
# ----------------------------------------------------------------------------
if __name__ == "__main__":
    key = jax.random.PRNGKey(0)
    k1, k2, k3, k4, k5 = jax.random.split(key, 5)

    batch, hidden = 8, 32

    # deterministic wrapped-model parameters
    model_params = {
        "w": jax.random.normal(k1, (hidden, hidden), dtype=jnp.float32) * 0.1,
        "b": jax.random.normal(k2, (1, hidden), dtype=jnp.float32) * 0.01,
    }

    swa_model = AveragedModelPallas(model_params)

    # forward pass (delegates to wrapped module, implemented as Pallas matmul)
    x = jax.random.normal(k3, (batch, hidden), dtype=jnp.float32)
    y = swa_model(x)
    jax.block_until_ready(y)

    # reference check for forward
    y_ref = x @ model_params["w"] + model_params["b"]
    assert jnp.allclose(y, y_ref, atol=1e-5), "forward mismatch"

    # simulate two SWA updates with "trained" model snapshots
    snap1 = {
        "w": model_params["w"] + jax.random.normal(k4, (hidden, hidden)) * 0.05,
        "b": model_params["b"] + 0.1,
    }
    snap2 = {
        "w": model_params["w"] + jax.random.normal(k5, (hidden, hidden)) * 0.05,
        "b": model_params["b"] - 0.2,
    }

    swa_model.update_parameters(snap1)   # n_averaged == 0 -> copy
    swa_model.update_parameters(snap2)   # n_averaged == 1 -> equal average

    jax.block_until_ready(swa_model._swa_leaves)

    # reference: after two updates, params == mean(snap1, snap2)
    w_expect = (snap1["w"] + snap2["w"]) / 2.0
    b_expect = (snap1["b"] + snap2["b"]) / 2.0
    p = swa_model.params
    assert jnp.allclose(p["w"], w_expect, atol=1e-5), "SWA w mismatch"
    assert jnp.allclose(p["b"], b_expect, atol=1e-5), "SWA b mismatch"
    assert p["w"].dtype == model_params["w"].dtype
    assert p["w"].shape == model_params["w"].shape
    assert swa_model.n_averaged == 2
    assert int(swa_model._n_dev[0]) == 2

    # forward with the averaged parameters still matches a plain-JAX reference
    y2 = swa_model(x)
    jax.block_until_ready(y2)
    assert jnp.allclose(y2, x @ w_expect + b_expect, atol=1e-5), "post-SWA forward mismatch"

    print("KERNEL_OK")
</pallas_src>

<mosaic_0001>
module attributes {stable_mosaic.version = 11 : i64} {
  func.func @_linear_kernel(%arg0: i32, %arg1: i32, %arg2: i32, %arg3: memref<8x32xf32, #tpu.memory_space<vmem>>, %arg4: memref<32x32xf32, #tpu.memory_space<vmem>>, %arg5: memref<1x32xf32, #tpu.memory_space<vmem>>, %arg6: memref<8x32xf32, #tpu.memory_space<vmem>>, %arg7: memref<8x32xf32, #tpu.memory_space<vmem>>) attributes {dimension_semantics = [#tpu.dimension_semantics<parallel>, #tpu.dimension_semantics<parallel>, #tpu.dimension_semantics<arbitrary>], iteration_bounds = array<i64: 1, 1, 1>, scalar_prefetch = 0 : i64, scratch_operands = 1 : i64, tpu.core_type = #tpu.core_type<tc>, window_params = [{transform_indices = @transform_0, window_bounds = array<i64: 8, 32>}, {transform_indices = @transform_1, window_bounds = array<i64: 32, 32>}, {transform_indices = @transform_2, window_bounds = array<i64: 1, 32>}, {transform_indices = @transform_3, window_bounds = array<i64: 8, 32>}]} {
    %c0_i32 = arith.constant 0 : i32
    %0 = arith.cmpi eq, %arg2, %c0_i32 : i32
    %1 = arith.extui %0 : i1 to i32
    %c0_i32_0 = arith.constant 0 : i32
    %2 = arith.cmpi ne, %1, %c0_i32_0 : i32
    scf.if %2 {
      %c0_10 = arith.constant 0 : index
      %c0_11 = arith.constant 0 : index
      %12 = vector.load %arg5[%c0_10, %c0_11] : memref<1x32xf32, #tpu.memory_space<vmem>>, vector<1x32xf32>
      %13 = vector.shape_cast %12 : vector<1x32xf32> to vector<1x32xf32>
      %14 = vector.broadcast %13 : vector<1x32xf32> to vector<8x32xf32>
      %c0_12 = arith.constant 0 : index
      %c0_13 = arith.constant 0 : index
      %15 = vector.load %arg7[%c0_12, %c0_13] : memref<8x32xf32, #tpu.memory_space<vmem>>, vector<8x32xf32>
      tpu.vector_store %arg7[%c0_12, %c0_13], %14 {strides = array<i32>} : memref<8x32xf32, #tpu.memory_space<vmem>>, vector<8x32xf32>,
    } else {
    }
    %c0 = arith.constant 0 : index
    %c0_1 = arith.constant 0 : index
    %3 = vector.load %arg7[%c0, %c0_1] : memref<8x32xf32, #tpu.memory_space<vmem>>, vector<8x32xf32>
    %c0_2 = arith.constant 0 : index
    %c0_3 = arith.constant 0 : index
    %4 = vector.load %arg3[%c0_2, %c0_3] : memref<8x32xf32, #tpu.memory_space<vmem>>, vector<8x32xf32>
    %c0_4 = arith.constant 0 : index
    %c0_5 = arith.constant 0 : index
    %5 = vector.load %arg4[%c0_4, %c0_5] : memref<32x32xf32, #tpu.memory_space<vmem>>, vector<32x32xf32>
    %cst = arith.constant dense<0.000000e+00> : vector<8x32xf32>
    %6 = tpu.matmul %4, %5, %cst {dimension_numbers = #tpu.dot_dimension_numbers<[1], [0], [0], [1], [0, 0, 1, 1], [], []>} : vector<8x32xf32>, vector<32x32xf32>, vector<8x32xf32> -> vector<8x32xf32>
    %7 = arith.addf %3, %6 : vector<8x32xf32>
    %c0_6 = arith.constant 0 : index
    %c0_7 = arith.constant 0 : index
    %8 = vector.load %arg7[%c0_6, %c0_7] : memref<8x32xf32, #tpu.memory_space<vmem>>, vector<8x32xf32>
    tpu.vector_store %arg7[%c0_6, %c0_7], %7 {strides = array<i32>} : memref<8x32xf32, #tpu.memory_space<vmem>>, vector<8x32xf32>,
    %c0_i32_8 = arith.constant 0 : i32
    %9 = arith.cmpi eq, %arg2, %c0_i32_8 : i32
    %10 = arith.extui %9 : i1 to i32
    %c0_i32_9 = arith.constant 0 : i32
    %11 = arith.cmpi ne, %10, %c0_i32_9 : i32
    scf.if %11 {
      %c0_10 = arith.constant 0 : index
      %c0_11 = arith.constant 0 : index
      %12 = vector.load %arg7[%c0_10, %c0_11] : memref<8x32xf32, #tpu.memory_space<vmem>>, vector<8x32xf32>
      %c0_12 = arith.constant 0 : index
      %c0_13 = arith.constant 0 : index
      %13 = vector.load %arg6[%c0_12, %c0_13] : memref<8x32xf32, #tpu.memory_space<vmem>>, vector<8x32xf32>
      tpu.vector_store %arg6[%c0_12, %c0_13], %12 {strides = array<i32>} : memref<8x32xf32, #tpu.memory_space<vmem>>, vector<8x32xf32>,
    } else {
    }
    return
  }
  func.func @transform_0(%arg0: i32, %arg1: i32, %arg2: i32) -> (i32, i32) {
    %c0_i32 = arith.constant 0 : i32
    return %arg0, %arg2 : i32, i32
  }
  func.func @transform_1(%arg0: i32, %arg1: i32, %arg2: i32) -> (i32, i32) {
    %c0_i32 = arith.constant 0 : i32
    return %arg2, %arg1 : i32, i32
  }
  func.func @transform_2(%arg0: i32, %arg1: i32, %arg2: i32) -> (i32, i32) {
    %c0_i32 = arith.constant 0 : i32
    %c0_i32_0 = arith.constant 0 : i32
    return %c0_i32, %arg1 : i32, i32
  }
  func.func @transform_3(%arg0: i32, %arg1: i32, %arg2: i32) -> (i32, i32) {
    %c0_i32 = arith.constant 0 : i32
    return %arg0, %arg1 : i32, i32
  }
}

</mosaic_0001>

<bundles_post_ra>
// kernel: tpu_custom_call.1
= control target key start
LH: loop header
LB: loop body
LE: loop exit
PB: predicated region body
PF: predicated region fallthrough
CT: control target
= control target key end

     0   :  { %8 = vsyncpa [#allocation4], 0  ;;  %s339_s0 = inlined_call_operand.hbm [shape: f32[8,32], index: 0, kind: input, shape index: {}]   ;;  %s340_s1 = inlined_call_operand.hbm [shape: f32[32,32], index: 1, kind: input, shape index: {}]   ;;  %s341_s2 = inlined_call_operand.vmem [shape: f32[1,32], index: 2, kind: input, shape index: {}]   ;;  %s342_s3 = inlined_call_operand.hbm [shape: f32[8,32], index: 3, kind: output, shape index: {}]  }
   0x1   :  { %9 = vsyncpa [#allocation7], 0 }
   0x2   :  { %10 = vsyncpa [#allocation5], 0  ;;  %s261_s12 = smov [#allocation3]   ;;  %s262_s14 = smov [#allocation6]  }
   0x3   :  { %s17_s13 = sshll.u32 %s261_s12, 4  ;;  %s26_s15 = sshll.u32 %s262_s14, 4  ;;  %s18_s13 = int_to_ptr.vmem [resolvable:$true] %s17_s13  ;;  %s289_s15 = int_to_ptr.vmem [resolvable:$true] %s26_s15 }
   0x4   :  { %s189_s18 = scalar_lea.hbm %s339_s0, 128 }
   0x5   :  { %p190_p0 = scmp.ne.s32.totalorder %s339_s0, %s189_s18  ;;  %p193_p1 = scmp.lt.u32.totalorder %s189_s18, %s339_s0 }
   0x7   :  { %p195_p2 = pnand %p193_p1, %p190_p0 }
   0x9   :  { %198 = shalt.err (!%p195_p2)
}
   0xa   :  { %s199_s23 = scalar_lea.vmem %s18_s13, 128  ;;  %p204_p4 = scmp.lt.s32.totalorder %s18_s13, %s18_s13 }
   0xb   :  { %p200_p3 = scmp.ne.s32.totalorder %s18_s13, %s199_s23  ;;  %p205_p5 = scmp.lt.s32.totalorder %s199_s23, %s199_s23 }
   0xd   :  { %p206_p6 = por %p205_p5, %p204_p4 }
   0xf   :  { %p207_p7 = pnand %p206_p6, %p200_p3 }
  0x11   :  { %210 = shalt.err (!%p207_p7)
}
  0x12   :  { %20 = dma.hbm_to_vmem [thread:$0]  %s339_s0, 128, %s18_s13, [#allocation4]  }
  0x13   :  { %s211_s28 = scalar_lea.hbm %s340_s1, 512 }
  0x14   :  { %p212_p8 = scmp.ne.s32.totalorder %s340_s1, %s211_s28  ;;  %p215_p9 = scmp.lt.u32.totalorder %s211_s28, %s340_s1 }
  0x16   :  { %p217_p10 = pnand %p215_p9, %p212_p8 }
  0x18   :  { %220 = shalt.err (!%p217_p10)
}
  0x19   :  { %s221_s6 = scalar_lea.vmem %s289_s15, 512  ;;  %p226_p12 = scmp.lt.s32.totalorder %s289_s15, %s289_s15 }
  0x1a   :  { %p222_p11 = scmp.ne.s32.totalorder %s289_s15, %s221_s6  ;;  %p227_p13 = scmp.lt.s32.totalorder %s221_s6, %s221_s6 }
  0x1c   :  { %p228_p0 = por %p227_p13, %p226_p12 }
  0x1e   :  { %p229_p1 = pnand %p228_p0, %p222_p11 }
  0x20   :  { %232 = shalt.err (!%p229_p1)
}
  0x21   :  { %s263_s0 = smov 128   ;;  %s264_s7 = smov 8  }
  0x22   :  { %32 = dma.hbm_to_vmem [thread:$0]  %s340_s1, 512, %s289_s15, [#allocation7], %s263_s0, %s263_s0, %s264_s7  }
  0x23   :  { %255 = dma.done.wait [#allocation4], 128  }
  0x24   :  { %256 = vsyncadd [#allocation4], 4294967168 }
  0x25   :  { %257 = dma.done.wait [#allocation7], 512  }
  0x26   :  { %258 = vsyncadd [#allocation7], 4294966784  ;;  %v265_v0 = vmov 0.0|0.0   ;;  %vm266_vm0 = vmmov 0   ;;  %v267_v1 = vmov 0.0   ;;  %v56_v2 = vld [vmem:[#allocation6] sm:$0xff] }
  0x27   :  { %175 = vmatprep.subr.bf16.mxu0 %v265_v0  ;;  %172 = vmatprep.mubr.msk.f32.mxu0 %vm266_vm0, %v267_v1  ;;  %v57_v3 = vld [vmem:[#allocation6 + $0x8] sm:$0xff]  ;;  %v58_v4 = vld [vmem:[#allocation6 + $0x10] sm:$0xff]  ;;  %v59_v6 = vld [vmem:[#allocation6 + $0x18] sm:$0xff]  ;;  %vm52_vm1 = vcmask 261120   ;;  %s268_s1 = smov [#allocation8]  }
  0x28   :  { %v176_v5 = vpack.c.bf16 %v57_v3, %v56_v2  ;;  %v157_v7 = vld [vmem:[%s341_s2] ss:$0 sm:$0xff]  ;;  %v179_v8 = vpack.c.bf16 %v59_v6, %v58_v4  ;;  %v55_v9 = vld [vmem:[#allocation3] sm:$0xff]  ;;  %s147_s12 = sshll.u32 %s268_s1, 4  ;;  %s148_s12 = int_to_ptr.vmem [resolvable:$true] %s147_s12 }
  0x29   :  { %53 = vst.msk [vmem:[#allocation2] sm:$0xff] %vm52_vm1, %v157_v7  ;;  %s233_s2 = scalar_lea.vmem %s148_s12, 128  ;;  %p238_p3 = scmp.lt.s32.totalorder %s148_s12, %s148_s12 }
  0x2a   :  { %177 = vmatpush3.bf16.msra.mxu0 %v176_v5  ;;  %p234_p2 = scmp.ne.s32.totalorder %s148_s12, %s233_s2  ;;  %p239_p4 = scmp.lt.s32.totalorder %s233_s2, %s233_s2 }
  0x2b   :  { %178 = vmatprep.subr.bf16.mxu0 %v265_v0 }
  0x2c   :  { %p240_p5 = por %p239_p4, %p238_p3 }
  0x2e   :  { %180 = vmatpush3.bf16.msra.mxu0 %v179_v8  ;;  %p241_p6 = pnand %p240_p5, %p234_p2 }
  0x30   :  { %v54_v10 = vld [vmem:[#allocation2] sm:$0xff] }
  0x31   :  { %173 = vmatmul.mubr.msk.f32.vlgmr.msra.gmra.mrb[0].mxu0 %vm52_vm1, %v55_v9 }
 0x104   :  { %v130_v11 = vpop.f32.mrb[0].mxu0 }
 0x105   :  { %v134_v12 = vadd.f32 %v130_v11, %v54_v10  ;;  %v174_v13 = vpop.f32.mrb[1].mxu0 }
 0x107   :  { %135 = vst.msk [vmem:[#allocation2] sm:$0xff] %vm52_vm1, %v134_v12 }
 0x10e   :  { %v139_v14 = vld [vmem:[#allocation2] sm:$0xff] }
 0x10f   :  { %140 = vst.msk [vmem:[#allocation8] sm:$0xff] %vm52_vm1, %v139_v14 }
 0x110   :  { %244 = shalt.err (!%p241_p6)
}
 0x111   :  { %s245_s15 = scalar_lea.hbm %s342_s3, 128 }
 0x112   :  { %p246_p7 = scmp.ne.s32.totalorder %s342_s3, %s245_s15  ;;  %p249_p8 = scmp.lt.u32.totalorder %s245_s15, %s342_s3 }
 0x114   :  { %p251_p9 = pnand %p249_p8, %p246_p7 }
 0x116   :  { %254 = shalt.err (!%p251_p9)
}
 0x117   :  { %150 = dma.vmem_to_hbm [thread:$0]  %s148_s12, 128, %s342_s3, [#allocation5]  }
 0x118   :  { %259 = dma.done.wait [#allocation5], 128  }
 0x119   :  { %260 = vsyncadd [#allocation5], 4294967168 }
 0x11a   :  { %154 = vsyncpa [#allocation4], 1 }
 0x11b   :  { %155 = vsyncpa [#allocation7], 1 }
 0x11c   :  { %156 = vsyncpa [#allocation5], 1 }

</bundles_post_ra>
